<compile_context>
chip_gen: v7x
topology: tpu7x:2x2x1
jax: 0.10.0
libtpu: 0.0.40
codegen_flags: <defaults>
</compile_context>

<pallas_src>
import functools

import jax
import jax.numpy as jnp
from jax.experimental import pallas as pl
from jax.experimental.pallas import tpu as pltpu


def _dice_ce_kernel(logits_ref, target_ref, weight_ref,
                    ce_num_ref, ce_den_ref, inter_ref, den_ref,
                    *, dice_p, ignore_index, total_p, tile_p, needs_mask):
    p_idx = pl.program_id(1)

    # Initialize the per-sample output accumulators on the first spatial tile.
    @pl.when(p_idx == 0)
    def _():
        ce_num_ref[...] = jnp.zeros_like(ce_num_ref)
        ce_den_ref[...] = jnp.zeros_like(ce_den_ref)
        inter_ref[...] = jnp.zeros_like(inter_ref)
        den_ref[...] = jnp.zeros_like(den_ref)

    # Cast to f32 inside the kernel (input may be bf16 -> halves DMA volume).
    logits = logits_ref[0].astype(jnp.float32)      # (C, T)
    tgt = target_ref[0]                             # (1, T) i32
    w = weight_ref[...]                             # (C, 1) f32
    C, T = logits.shape

    valid = tgt != ignore_index                     # (1, T)
    if needs_mask:
        # Last tile may run past P; mask out-of-bounds lanes.
        lane = jax.lax.broadcasted_iota(jnp.int32, (1, T), 1)
        in_bounds = (p_idx * tile_p + lane) < total_p
        valid = jnp.logical_and(valid, in_bounds)
        logits = jnp.where(in_bounds, logits, 0.0)

    validf = valid.astype(jnp.float32)
    tgt_clamped = jnp.where(valid, tgt, 0)                            # (1, T)
    class_ids = jax.lax.broadcasted_iota(jnp.int32, (C, T), 0)        # (C, T)
    onehot = (class_ids == tgt_clamped).astype(jnp.float32) * validf  # (C, T)

    # log-softmax / softmax over the class (sublane) axis.
    m = jnp.max(logits, axis=0, keepdims=True)                        # (1, T)
    z = logits - m
    ez = jnp.exp(z)
    sez = jnp.sum(ez, axis=0, keepdims=True)                          # (1, T)
    log_sm = z - jnp.log(sez)                                         # (C, T)
    prob = ez * pl.reciprocal(sez, approx=False)                      # (C, T)

    # ---- weighted cross entropy: reduce over lanes first, weight after ----
    s1 = jnp.sum(onehot * log_sm, axis=1, keepdims=True)              # (C, 1)
    s2 = jnp.sum(onehot, axis=1, keepdims=True)                       # (C, 1)
    ce_num_ref[0] += -jnp.sum(w * s1, keepdims=True)                  # (1, 1)
    ce_den_ref[0] += jnp.sum(w * s2, keepdims=True)                   # (1, 1)

    # ---- dice statistics for this sample / tile (per class) ----
    pred = prob * validf                                              # (C, T)
    if dice_p == 1:
        pred_p = pred
    elif dice_p == 2:
        pred_p = pred * pred
    else:
        pred_p = pred ** dice_p
    inter_ref[0] += jnp.sum(pred * onehot, axis=1, keepdims=True)     # (C, 1)
    den_ref[0] += jnp.sum(pred_p, axis=1, keepdims=True) + s2         # (C, 1)


def _choose_tile_p(P, C):
    """Pick a spatial tile that keeps (C, tile_p) f32 temporaries ~a few MiB."""
    budget_elems = (4 * 1024 * 1024) // (4 * 8 * max(C, 1))  # ~8 live temps
    t = max(512, min(8192, budget_elems))
    t = max(128, (t // 128) * 128)
    if P <= t:
        return P, 1
    return t, pl.cdiv(P, t)


def dice_ce_loss(predict, target, loss_weight=None, dice_weight=0.5,
                 dice_smooth=1.0, dice_p=1, ignore_index=-100, tile_p=None):
    """predict: (N, C, H, W) float logits; target: (N, H, W) int class ids."""
    N, C, H, W = predict.shape
    P = H * W
    logits = predict.reshape(N, C, P)                 # keep native dtype
    tgt = target.reshape(N, 1, P).astype(jnp.int32)
    if loss_weight is None:
        w = jnp.ones((C, 1), jnp.float32)
    else:
        w = jnp.asarray(loss_weight, jnp.float32).reshape(C, 1)

    if tile_p is None:
        tile_p, num_p = _choose_tile_p(P, C)
    else:
        tile_p = min(tile_p, P)
        num_p = pl.cdiv(P, tile_p)
    needs_mask = (P % tile_p) != 0

    kernel = functools.partial(
        _dice_ce_kernel,
        dice_p=int(dice_p),
        ignore_index=int(ignore_index),
        total_p=P,
        tile_p=tile_p,
        needs_mask=needs_mask,
    )

    itemsize = jnp.dtype(logits.dtype).itemsize
    cost = pl.CostEstimate(
        flops=int(12 * N * C * P),
        transcendentals=int(N * (C + 1) * P),
        bytes_accessed=int(N * C * P * itemsize + N * P * 4
                           + (N * (2 * C + 2) + C) * 4),
    )

    ce_num, ce_den, inter, den = pl.pallas_call(
        kernel,
        out_shape=(
            jax.ShapeDtypeStruct((N, 1, 1), jnp.float32),   # CE numerator
            jax.ShapeDtypeStruct((N, 1, 1), jnp.float32),   # CE denominator
            jax.ShapeDtypeStruct((N, C, 1), jnp.float32),   # dice intersection
            jax.ShapeDtypeStruct((N, C, 1), jnp.float32),   # dice denominator
        ),
        grid_spec=pltpu.PrefetchScalarGridSpec(
            num_scalar_prefetch=0,
            grid=(N, num_p),
            in_specs=[
                pl.BlockSpec((1, C, tile_p), lambda n, p: (n, 0, p)),
                pl.BlockSpec((1, 1, tile_p), lambda n, p: (n, 0, p)),
                pl.BlockSpec((C, 1), lambda n, p: (0, 0)),
            ],
            out_specs=(
                pl.BlockSpec((1, 1, 1), lambda n, p: (n, 0, 0)),
                pl.BlockSpec((1, 1, 1), lambda n, p: (n, 0, 0)),
                pl.BlockSpec((1, C, 1), lambda n, p: (n, 0, 0)),
                pl.BlockSpec((1, C, 1), lambda n, p: (n, 0, 0)),
            ),
        ),
        compiler_params=pltpu.CompilerParams(
            dimension_semantics=("parallel", "arbitrary")),
        cost_estimate=cost,
    )(logits, tgt, w)

    # Tiny final combine in plain JAX (lets the batch axis stay "parallel").
    ce = jnp.sum(ce_num) / jnp.sum(ce_den)
    dice_nc = 1.0 - (2.0 * inter[:, :, 0] + dice_smooth) / (den[:, :, 0] + dice_smooth)
    dice = jnp.sum(jnp.mean(dice_nc, axis=0) * w[:, 0]) / C
    return dice_weight * dice + (1.0 - dice_weight) * ce


def _reference_loss(predict, target, weight, dice_weight, dice_smooth,
                    dice_p, ignore_index):
    N, C, H, W = predict.shape
    x = predict.reshape(N, C, -1).astype(jnp.float32)
    t = target.reshape(N, 1, -1).astype(jnp.int32)
    valid = (t != ignore_index)
    tgt = jnp.where(valid, t, 0)
    onehot = ((jnp.arange(C)[None, :, None] == tgt) & valid).astype(jnp.float32)
    logp = jax.nn.log_softmax(x, axis=1)
    prob = jax.nn.softmax(x, axis=1)
    wv = weight[None, :, None]
    ce = -jnp.sum(onehot * wv * logp) / jnp.sum(onehot * wv)
    pred = prob * valid.astype(jnp.float32)
    inter = jnp.sum(pred * onehot, axis=2)
    den = jnp.sum(pred ** dice_p + onehot, axis=2)
    dice_nc = 1.0 - (2.0 * inter + dice_smooth) / (den + dice_smooth)
    dice = jnp.sum(jnp.mean(dice_nc, axis=0) * weight) / C
    return dice_weight * dice + (1.0 - dice_weight) * ce


if __name__ == "__main__":
    key = jax.random.PRNGKey(0)
    k1, k2 = jax.random.split(key)

    N, C, H, W = 2, 4, 16, 16
    predict = jax.random.normal(k1, (N, C, H, W), jnp.float32)
    target = jax.random.randint(k2, (N, H, W), 0, C, jnp.int32)
    # sprinkle a few ignored pixels deterministically
    target = target.at[0, 0, :3].set(-100)

    loss_weight = jnp.array([1.0, 2.0, 0.5, 1.5], jnp.float32)

    loss = dice_ce_loss(predict, target, loss_weight=loss_weight,
                        dice_weight=0.5, dice_smooth=1.0, dice_p=1,
                        ignore_index=-100)
    loss = jax.block_until_ready(loss)

    ref = _reference_loss(predict, target, loss_weight, 0.5, 1.0, 1, -100)
    assert jnp.allclose(loss, ref, rtol=1e-5, atol=1e-5), (loss, ref)

    print("KERNEL_OK")
</pallas_src>

<mosaic_0001>
module attributes {stable_mosaic.version = 11 : i64} {
  func.func @_dice_ce_kernel(%arg0: i32, %arg1: i32, %arg2: memref<1x4x256xf32, #tpu.memory_space<vmem>>, %arg3: memref<1x1x256xi32, #tpu.memory_space<vmem>>, %arg4: memref<4x1xf32, #tpu.memory_space<vmem>>, %arg5: memref<1x1x1xf32, #tpu.memory_space<vmem>>, %arg6: memref<1x1x1xf32, #tpu.memory_space<vmem>>, %arg7: memref<1x4x1xf32, #tpu.memory_space<vmem>>, %arg8: memref<1x4x1xf32, #tpu.memory_space<vmem>>) attributes {dimension_semantics = [#tpu.dimension_semantics<parallel>, #tpu.dimension_semantics<arbitrary>], iteration_bounds = array<i64: 2, 1>, scalar_prefetch = 0 : i64, scratch_operands = 0 : i64, tpu.core_type = #tpu.core_type<tc>, window_params = [{transform_indices = @transform_0, window_bounds = array<i64: 1, 4, 256>}, {transform_indices = @transform_1, window_bounds = array<i64: 1, 1, 256>}, {pipeline_mode = #tpu.pipeline_mode<synchronous>, transform_indices = @transform_2, window_bounds = array<i64: 4, 1>}, {transform_indices = @transform_3, window_bounds = array<i64: 1, 1, 1>}, {transform_indices = @transform_4, window_bounds = array<i64: 1, 1, 1>}, {transform_indices = @transform_5, window_bounds = array<i64: 1, 4, 1>}, {transform_indices = @transform_6, window_bounds = array<i64: 1, 4, 1>}]} {
    %c0_i32 = arith.constant 0 : i32
    %0 = arith.cmpi eq, %arg1, %c0_i32 : i32
    %1 = arith.extui %0 : i1 to i32
    %c0_i32_0 = arith.constant 0 : i32
    %2 = arith.cmpi ne, %1, %c0_i32_0 : i32
    scf.if %2 {
      %cst_41 = arith.constant 0.000000e+00 : f32
      %85 = vector.broadcast %cst_41 : f32 to vector<1x1x1xf32>
      %c0_42 = arith.constant 0 : index
      %c0_43 = arith.constant 0 : index
      %c0_44 = arith.constant 0 : index
      %86 = vector.load %arg5[%c0_42, %c0_43, %c0_44] : memref<1x1x1xf32, #tpu.memory_space<vmem>>, vector<1x1x1xf32>
      tpu.vector_store %arg5[%c0_42, %c0_43, %c0_44], %85 {strides = array<i32>} : memref<1x1x1xf32, #tpu.memory_space<vmem>>, vector<1x1x1xf32>,
      %cst_45 = arith.constant 0.000000e+00 : f32
      %87 = vector.broadcast %cst_45 : f32 to vector<1x1x1xf32>
      %c0_46 = arith.constant 0 : index
      %c0_47 = arith.constant 0 : index
      %c0_48 = arith.constant 0 : index
      %88 = vector.load %arg6[%c0_46, %c0_47, %c0_48] : memref<1x1x1xf32, #tpu.memory_space<vmem>>, vector<1x1x1xf32>
      tpu.vector_store %arg6[%c0_46, %c0_47, %c0_48], %87 {strides = array<i32>} : memref<1x1x1xf32, #tpu.memory_space<vmem>>, vector<1x1x1xf32>,
      %cst_49 = arith.constant 0.000000e+00 : f32
      %89 = vector.broadcast %cst_49 : f32 to vector<1x4x1xf32>
      %c0_50 = arith.constant 0 : index
      %c0_51 = arith.constant 0 : index
      %c0_52 = arith.constant 0 : index
      %90 = vector.load %arg7[%c0_50, %c0_51, %c0_52] : memref<1x4x1xf32, #tpu.memory_space<vmem>>, vector<1x4x1xf32>
      tpu.vector_store %arg7[%c0_50, %c0_51, %c0_52], %89 {strides = array<i32>} : memref<1x4x1xf32, #tpu.memory_space<vmem>>, vector<1x4x1xf32>,
      %cst_53 = arith.constant 0.000000e+00 : f32
      %91 = vector.broadcast %cst_53 : f32 to vector<1x4x1xf32>
      %c0_54 = arith.constant 0 : index
      %c0_55 = arith.constant 0 : index
      %c0_56 = arith.constant 0 : index
      %92 = vector.load %arg8[%c0_54, %c0_55, %c0_56] : memref<1x4x1xf32, #tpu.memory_space<vmem>>, vector<1x4x1xf32>
      tpu.vector_store %arg8[%c0_54, %c0_55, %c0_56], %91 {strides = array<i32>} : memref<1x4x1xf32, #tpu.memory_space<vmem>>, vector<1x4x1xf32>,
    } else {
    }
    %c0 = arith.constant 0 : index
    %c0_1 = arith.constant 0 : index
    %c0_2 = arith.constant 0 : index
    %3 = vector.load %arg2[%c0, %c0_1, %c0_2] : memref<1x4x256xf32, #tpu.memory_space<vmem>>, vector<1x4x256xf32>
    %4 = vector.shape_cast %3 : vector<1x4x256xf32> to vector<4x256xf32>
    %c0_3 = arith.constant 0 : index
    %c0_4 = arith.constant 0 : index
    %c0_5 = arith.constant 0 : index
    %5 = vector.load %arg3[%c0_3, %c0_4, %c0_5] : memref<1x1x256xi32, #tpu.memory_space<vmem>>, vector<1x1x256xi32>
    %6 = vector.shape_cast %5 : vector<1x1x256xi32> to vector<1x256xi32>
    %c0_6 = arith.constant 0 : index
    %c0_7 = arith.constant 0 : index
    %7 = vector.load %arg4[%c0_6, %c0_7] : memref<4x1xf32, #tpu.memory_space<vmem>>, vector<4x1xf32>
    %c-100_i32 = arith.constant -100 : i32
    %8 = vector.broadcast %c-100_i32 : i32 to vector<1x256xi32>
    %9 = arith.cmpi ne, %6, %8 : vector<1x256xi32>
    %10 = arith.extui %9 : vector<1x256xi1> to vector<1x256xi32>
    %11 = arith.sitofp %10 : vector<1x256xi32> to vector<1x256xf32>
    %c0_i32_8 = arith.constant 0 : i32
    %12 = vector.broadcast %c0_i32_8 : i32 to vector<1x256xi32>
    %13 = arith.select %9, %6, %12 : vector<1x256xi1>, vector<1x256xi32>
    %14 = tpu.iota {dimensions = array<i32: 0>} : vector<4x256xi32>
    %15 = vector.broadcast %13 : vector<1x256xi32> to vector<4x256xi32>
    %16 = arith.cmpi eq, %14, %15 : vector<4x256xi32>
    %17 = arith.extui %16 : vector<4x256xi1> to vector<4x256xi32>
    %18 = arith.sitofp %17 : vector<4x256xi32> to vector<4x256xf32>
    %19 = vector.broadcast %11 : vector<1x256xf32> to vector<4x256xf32>
    %20 = arith.mulf %18, %19 : vector<4x256xf32>
    %cst = arith.constant dense<0xFF800000> : vector<256xf32>
    %21 = vector.multi_reduction <maximumf>, %4, %cst [0] : vector<4x256xf32> to vector<256xf32>
    %22 = vector.shape_cast %21 : vector<256xf32> to vector<1x256xf32>
    %23 = vector.broadcast %22 : vector<1x256xf32> to vector<4x256xf32>
    %24 = arith.subf %4, %23 : vector<4x256xf32>
    %25 = math.exp %24 : vector<4x256xf32>
    %cst_9 = arith.constant dense<0.000000e+00> : vector<256xf32>
    %26 = vector.multi_reduction <add>, %25, %cst_9 [0] : vector<4x256xf32> to vector<256xf32>
    %27 = vector.shape_cast %26 : vector<256xf32> to vector<1x256xf32>
    %28 = math.log %27 : vector<1x256xf32>
    %29 = vector.broadcast %28 : vector<1x256xf32> to vector<4x256xf32>
    %30 = arith.subf %24, %29 : vector<4x256xf32>
    %31 = tpu.reciprocal %27 : vector<1x256xf32> -> vector<1x256xf32>
    %32 = vector.broadcast %31 : vector<1x256xf32> to vector<4x256xf32>
    %33 = arith.mulf %25, %32 : vector<4x256xf32>
    %34 = arith.mulf %20, %30 : vector<4x256xf32>
    %cst_10 = arith.constant dense<0.000000e+00> : vector<4xf32>
    %35 = vector.multi_reduction <add>, %34, %cst_10 [1] : vector<4x256xf32> to vector<4xf32>
    %36 = vector.shape_cast %35 : vector<4xf32> to vector<4x1xf32>
    %cst_11 = arith.constant dense<0.000000e+00> : vector<4xf32>
    %37 = vector.multi_reduction <add>, %20, %cst_11 [1] : vector<4x256xf32> to vector<4xf32>
    %38 = vector.shape_cast %37 : vector<4xf32> to vector<4x1xf32>
    %c0_12 = arith.constant 0 : index
    %c0_13 = arith.constant 0 : index
    %c0_14 = arith.constant 0 : index
    %39 = vector.load %arg5[%c0_12, %c0_13, %c0_14] : memref<1x1x1xf32, #tpu.memory_space<vmem>>, vector<1x1x1xf32>
    %40 = vector.shape_cast %39 : vector<1x1x1xf32> to vector<1x1xf32>
    %41 = arith.mulf %7, %36 : vector<4x1xf32>
    %42 = vector.shape_cast %41 : vector<4x1xf32> to vector<1x4x1xf32>
    %cst_15 = arith.constant dense<0.000000e+00> : vector<1xf32>
    %43 = vector.multi_reduction <add>, %42, %cst_15 [1, 2] : vector<1x4x1xf32> to vector<1xf32>
    %44 = vector.shape_cast %43 : vector<1xf32> to vector<1x1x1xf32>
    %45 = vector.extract %44[0, 0, 0] : f32 from vector<1x1x1xf32>
    %46 = vector.broadcast %45 : f32 to vector<1x1xf32>
    %cst_16 = arith.constant 0.000000e+00 : f32
    %47 = vector.broadcast %cst_16 : f32 to vector<1x1xf32>
    %48 = arith.subf %47, %46 : vector<1x1xf32>
    %49 = arith.addf %40, %48 : vector<1x1xf32>
    %c0_17 = arith.constant 0 : index
    %c0_18 = arith.constant 0 : index
    %c0_19 = arith.constant 0 : index
    %50 = vector.load %arg5[%c0_17, %c0_18, %c0_19] : memref<1x1x1xf32, #tpu.memory_space<vmem>>, vector<1x1x1xf32>
    %51 = vector.shape_cast %50 : vector<1x1x1xf32> to vector<1x1xf32>
    %52 = vector.shape_cast %49 : vector<1x1xf32> to vector<1x1x1xf32>
    tpu.vector_store %arg5[%c0_17, %c0_18, %c0_19], %52 {strides = array<i32>} : memref<1x1x1xf32, #tpu.memory_space<vmem>>, vector<1x1x1xf32>,
    %c0_20 = arith.constant 0 : index
    %c0_21 = arith.constant 0 : index
    %c0_22 = arith.constant 0 : index
    %53 = vector.load %arg6[%c0_20, %c0_21, %c0_22] : memref<1x1x1xf32, #tpu.memory_space<vmem>>, vector<1x1x1xf32>
    %54 = vector.shape_cast %53 : vector<1x1x1xf32> to vector<1x1xf32>
    %55 = arith.mulf %7, %38 : vector<4x1xf32>
    %56 = vector.shape_cast %55 : vector<4x1xf32> to vector<1x4x1xf32>
    %cst_23 = arith.constant dense<0.000000e+00> : vector<1xf32>
    %57 = vector.multi_reduction <add>, %56, %cst_23 [1, 2] : vector<1x4x1xf32> to vector<1xf32>
    %58 = vector.shape_cast %57 : vector<1xf32> to vector<1x1x1xf32>
    %59 = vector.extract %58[0, 0, 0] : f32 from vector<1x1x1xf32>
    %60 = vector.broadcast %59 : f32 to vector<1x1xf32>
    %61 = arith.addf %54, %60 : vector<1x1xf32>
    %c0_24 = arith.constant 0 : index
    %c0_25 = arith.constant 0 : index
    %c0_26 = arith.constant 0 : index
    %62 = vector.load %arg6[%c0_24, %c0_25, %c0_26] : memref<1x1x1xf32, #tpu.memory_space<vmem>>, vector<1x1x1xf32>
    %63 = vector.shape_cast %62 : vector<1x1x1xf32> to vector<1x1xf32>
    %64 = vector.shape_cast %61 : vector<1x1xf32> to vector<1x1x1xf32>
    tpu.vector_store %arg6[%c0_24, %c0_25, %c0_26], %64 {strides = array<i32>} : memref<1x1x1xf32, #tpu.memory_space<vmem>>, vector<1x1x1xf32>,
    %65 = vector.broadcast %11 : vector<1x256xf32> to vector<4x256xf32>
    %66 = arith.mulf %33, %65 : vector<4x256xf32>
    %c0_27 = arith.constant 0 : index
    %c0_28 = arith.constant 0 : index
    %c0_29 = arith.constant 0 : index
    %67 = vector.load %arg7[%c0_27, %c0_28, %c0_29] : memref<1x4x1xf32, #tpu.memory_space<vmem>>, vector<1x4x1xf32>
    %68 = vector.shape_cast %67 : vector<1x4x1xf32> to vector<4x1xf32>
    %69 = arith.mulf %66, %20 : vector<4x256xf32>
    %cst_30 = arith.constant dense<0.000000e+00> : vector<4xf32>
    %70 = vector.multi_reduction <add>, %69, %cst_30 [1] : vector<4x256xf32> to vector<4xf32>
    %71 = vector.shape_cast %70 : vector<4xf32> to vector<4x1xf32>
    %72 = arith.addf %68, %71 : vector<4x1xf32>
    %c0_31 = arith.constant 0 : index
    %c0_32 = arith.constant 0 : index
    %c0_33 = arith.constant 0 : index
    %73 = vector.load %arg7[%c0_31, %c0_32, %c0_33] : memref<1x4x1xf32, #tpu.memory_space<vmem>>, vector<1x4x1xf32>
    %74 = vector.shape_cast %73 : vector<1x4x1xf32> to vector<4x1xf32>
    %75 = vector.shape_cast %72 : vector<4x1xf32> to vector<1x4x1xf32>
    tpu.vector_store %arg7[%c0_31, %c0_32, %c0_33], %75 {strides = array<i32>} : memref<1x4x1xf32, #tpu.memory_space<vmem>>, vector<1x4x1xf32>,
    %c0_34 = arith.constant 0 : index
    %c0_35 = arith.constant 0 : index
    %c0_36 = arith.constant 0 : index
    %76 = vector.load %arg8[%c0_34, %c0_35, %c0_36] : memref<1x4x1xf32, #tpu.memory_space<vmem>>, vector<1x4x1xf32>
    %77 = vector.shape_cast %76 : vector<1x4x1xf32> to vector<4x1xf32>
    %cst_37 = arith.constant dense<0.000000e+00> : vector<4xf32>
    %78 = vector.multi_reduction <add>, %66, %cst_37 [1] : vector<4x256xf32> to vector<4xf32>
    %79 = vector.shape_cast %78 : vector<4xf32> to vector<4x1xf32>
    %80 = arith.addf %79, %38 : vector<4x1xf32>
    %81 = arith.addf %77, %80 : vector<4x1xf32>
    %c0_38 = arith.constant 0 : index
    %c0_39 = arith.constant 0 : index
    %c0_40 = arith.constant 0 : index
    %82 = vector.load %arg8[%c0_38, %c0_39, %c0_40] : memref<1x4x1xf32, #tpu.memory_space<vmem>>, vector<1x4x1xf32>
    %83 = vector.shape_cast %82 : vector<1x4x1xf32> to vector<4x1xf32>
    %84 = vector.shape_cast %81 : vector<4x1xf32> to vector<1x4x1xf32>
    tpu.vector_store %arg8[%c0_38, %c0_39, %c0_40], %84 {strides = array<i32>} : memref<1x4x1xf32, #tpu.memory_space<vmem>>, vector<1x4x1xf32>,
    return
  }
  func.func @transform_0(%arg0: i32, %arg1: i32) -> (i32, i32, i32) {
    %c0_i32 = arith.constant 0 : i32
    %c0_i32_0 = arith.constant 0 : i32
    return %arg0, %c0_i32, %arg1 : i32, i32, i32
  }
  func.func @transform_1(%arg0: i32, %arg1: i32) -> (i32, i32, i32) {
    %c0_i32 = arith.constant 0 : i32
    %c0_i32_0 = arith.constant 0 : i32
    return %arg0, %c0_i32, %arg1 : i32, i32, i32
  }
  func.func @transform_2(%arg0: i32, %arg1: i32) -> (i32, i32) {
    %c0_i32 = arith.constant 0 : i32
    %c0_i32_0 = arith.constant 0 : i32
    %c0_i32_1 = arith.constant 0 : i32
    return %c0_i32, %c0_i32_0 : i32, i32
  }
  func.func @transform_3(%arg0: i32, %arg1: i32) -> (i32, i32, i32) {
    %c0_i32 = arith.constant 0 : i32
    %c0_i32_0 = arith.constant 0 : i32
    %c0_i32_1 = arith.constant 0 : i32
    return %arg0, %c0_i32, %c0_i32_0 : i32, i32, i32
  }
  func.func @transform_4(%arg0: i32, %arg1: i32) -> (i32, i32, i32) {
    %c0_i32 = arith.constant 0 : i32
    %c0_i32_0 = arith.constant 0 : i32
    %c0_i32_1 = arith.constant 0 : i32
    return %arg0, %c0_i32, %c0_i32_0 : i32, i32, i32
  }
  func.func @transform_5(%arg0: i32, %arg1: i32) -> (i32, i32, i32) {
    %c0_i32 = arith.constant 0 : i32
    %c0_i32_0 = arith.constant 0 : i32
    %c0_i32_1 = arith.constant 0 : i32
    return %arg0, %c0_i32, %c0_i32_0 : i32, i32, i32
  }
  func.func @transform_6(%arg0: i32, %arg1: i32) -> (i32, i32, i32) {
    %c0_i32 = arith.constant 0 : i32
    %c0_i32_0 = arith.constant 0 : i32
    %c0_i32_1 = arith.constant 0 : i32
    return %arg0, %c0_i32, %c0_i32_0 : i32, i32, i32
  }
}

</mosaic_0001>

<bundles_post_ra>
// kernel: tpu_custom_call.1
= control target key start
LH: loop header
LB: loop body
LE: loop exit
PB: predicated region body
PF: predicated region fallthrough
CT: control target
= control target key end

     0   :  { %12 = vsyncpa [#allocation3], 0  ;;  %s1093_s0 = inlined_call_operand.hbm [shape: f32[2,4,256], index: 0, kind: input, shape index: {}]   ;;  %s1094_s1 = inlined_call_operand.vmem [shape: s32[2,1,256], index: 1, kind: input, shape index: {}]   ;;  %s1095_s2 = inlined_call_operand.vmem [shape: f32[4,1], index: 2, kind: input, shape index: {}]   ;;  %s1096_s3 = inlined_call_operand.vmem [shape: f32[2,1,1], index: 3, kind: output, shape index: {0}]   ;;  %s1097_s4 = inlined_call_operand.vmem [shape: f32[2,1,1], index: 4, kind: output, shape index: {1}]   ;;  %s1098_s5 = inlined_call_operand.vmem [shape: f32[2,4,1], index: 5, kind: output, shape index: {2}]   ;;  %s1099_s6 = inlined_call_operand.vmem [shape: f32[2,4,1], index: 6, kind: output, shape index: {3}]  }
   0x1   :  { %14 = vsyncpa [#allocation3 + $0x1], 0  ;;  %s908_s21 = smov 0   ;;  %s910_s22 = smov 0  }
   0x2   :  { %s912_s23 = smov 0   ;;  %s914_s24 = smov 0  }
   0x3   :  { %s916_s25 = smov 0   ;;  %s918_s26 = smov 0  }
   0x4 LB: > { %s700_s27 = sadd.s32 4294967295, %s869_s26   ;;  %s32_s28 = sadd.s32 1, %s865_s25  ;;  %s869_s26 = sphi %s918_s26, %s20_s26   ;;  %s865_s25 = sphi %s916_s25, %s1109_s25   ;;  %s861_s24 = sphi %s914_s24, %s1108_s24   ;;  %s857_s23 = sphi %s912_s23, %s1107_s23   ;;  %s853_s22 = sphi %s910_s22, %s1106_s22   ;;  %s849_s21 = sphi %s908_s21, %s1105_s21  }
   0x5   : > { %p34_p0 = scmp.ge.s32.totalorder %s32_s28, 2  ;;  %s41_s29 = sadd.s32 1, %s857_s23 }
   0x6   : > { %p48_p1 = scmp.ne.s32.totalorder %s857_s23, %s853_s22  ;;  %p49_p2 = scmp.eq.s32.totalorder %s869_s26, 0 }
   0x7   : > { %s1111_s28 = smov (%p34_p0, %s32_s28), 0  ;;  %p54_p4 = scmp.ne.s32.totalorder %s853_s22, %s849_s21 }
   0x8   : > { %p944_p3 = por %p49_p2, %p48_p1  ;;  %s36_s7 = ssub.s32 %s865_s25, %s1111_s28 }
   0x9   : > { %p55_p5 = scmp.eq.s32.totalorder %s700_s27, 0  ;;  %p39_p6 = scmp.eq.s32.totalorder %s36_s7, 0 }
   0xa   : > { %p728_p8 = scmp.lt.s32.totalorder %s869_s26, 2  ;;  %s234_s10 = sand.u32 1, %s857_s23  }
   0xb   : > { %p951_p7 = por %p55_p5, %p54_p4  ;;  %s717_s11 = sshll.u32 %s865_s25, 7 }
   0xc   : > { %s957_s9 = scalar_select %p39_p6, %s857_s23, %s41_s29  }
   0xd   : > { %s704_s12 = sshll.u32 %s234_s10, 3  ;;  %s964_s15 = scalar_lea.hbm %s1093_s0, %s717_s11 }
   0xe   : > { %s238_s16 = scalar_lea.vmem [#allocation2], %s704_s12  ;;  %p968_p9 = pnand %p728_p8, %p944_p3 }
   0xf   : > { %s248_s17 = sshll.u32 %s238_s16, 4  ;;  %s235_s19 = scalar_lea.sflag [#allocation3], %s234_s10  ;;  %s972_s17 = int_to_ptr.vmem [resolvable:$true] %s248_s17 }
  0x10   : > { %s789_s20 = scalar_lea.hbm %s964_s15, 128  ;;  %p791_p13 = pneg %p968_p9 }
  0x11   : > { %p790_p12 = scmp.ne.s32.totalorder %s964_s15, %s789_s20  ;;  %s794_s29 = scalar_lea.hbm %s1093_s0, 256 }
  0x12   : > { %p795_p2 = scmp.lt.u32.totalorder %s964_s15, %s1093_s0  ;;  %p796_p3 = scmp.lt.u32.totalorder %s794_s29, %s789_s20 }
  0x13   : > { %p792_p0 = pnand %p791_p13, %p790_p12  ;;  %p798_p5 = scmp.lt.u32.totalorder %s789_s20, %s964_s15 }
  0x14   : > { %p797_p4 = por %p796_p3, %p795_p2 }
  0x15   : > { %p793_p1 = pneg %p792_p0 }
  0x16   : > { %p799_p6 = por %p798_p5, %p797_p4 }
  0x18   : > { %p800_p8 = pnand %p799_p6, %p793_p1 }
  0x1a   : > { %803 = shalt.err (!%p800_p8)
}
  0x1b   : > { %s804_s10 = scalar_lea.vmem %s972_s17, 128  ;;  %s871_s11 = smov [#allocation2]  }
  0x1c   : > { %p805_p12 = scmp.ne.s32.totalorder %s972_s17, %s804_s10  ;;  %s809_s12 = sshll.u32 %s871_s11, 4  ;;  %s810_s12 = int_to_ptr.vmem [resolvable:$false] %s809_s12 }
  0x1d   : > { %s811_s13 = scalar_lea.vmem %s810_s12, 256  ;;  %p812_p11 = scmp.lt.s32.totalorder %s972_s17, %s810_s12 }
  0x1e   : > { %p807_p0 = pnand %p805_p12, %p791_p13  ;;  %p813_p2 = scmp.lt.s32.totalorder %s811_s13, %s804_s10 }
  0x20   : > { %p808_p10 = pneg %p807_p0  ;;  %p814_p3 = por %p813_p2, %p812_p11 }
  0x22   : > { %p815_p4 = pnand %p814_p3, %p808_p10 }
  0x24   : > { %818 = shalt.err (!%p815_p4)
}
  0x25   : > { %727 = dma.hbm_to_vmem [thread:$0]  (!%p968_p9), %s964_s15, 128, %s972_s17, %s235_s19  }
  0x26   : > { %p1103_p1 = scmp.lt.s32.totalorder %s869_s26, 3  ;;  %p1104_p5 = scmp.ge.s32.totalorder %s869_s26, 1 }
  0x28   : > { %p266_p13 = pnand %p1104_p5, %p1103_p1 }
  0x29   : > { %s271_s14 = sand.u32 (!%p266_p13), 1, %s853_s22  }
  0x2a   : > { %269 = sbr.rel (%p266_p13) target bundleno = 479 (0x1df), region = 32  ;;  %s708_s16 = sshll.u32 (!%p266_p13), %s271_s14, 3 }
  0x2b   : > { %s272_s20 = scalar_lea.sflag (!%p266_p13), [#allocation3], %s271_s14  ;;  %s275_s21 = scalar_lea.vmem (!%p266_p13), [#allocation2], %s708_s16 }
  0x31   : > { %844 = dma.done.wait (%p951_p7), %s272_s20, 128  }
  0x32   : > { %846 = vsyncadd (%p951_p7), %s272_s20, 4294967168  ;;  %vm394_vm0 = vcmask 1043456   ;;  %v355_v0 = vld [vmem:[%s275_s21] sm:$0xff]  ;;  %p323_p7 = scmp.lt.s32.totalorder %s861_s24, 1  ;;  %v362_v28 = vlaneseq  ;;  %v872_v43 = vmov 0.0   ;;  %vm352_vm4 = vcmask 3072  }
  0x33   : > { %v392_v1 = vcombine.high %v355_v0, %v355_v0  ;;  %v395_v2 = vsel %vm394_vm0, %v355_v0, -inf  ;;  %vm349_vm5 = vcmask 0  }
  0x34   : > { %v396_v3 = vrot.slane %v395_v2, 4  ;;  %s1113_s24 = smov (!%p323_p7, %s861_s24), 1  ;;  %v363_v34 = vshrl.u32 %v362_v28, 7 }
  0x35   : > { %v402_v5 = vsel %vm394_vm0, %v392_v1, -inf  ;;  %s709_s8 = sshll.u32 %s1113_s24, 1  ;;  %s710_s19 = sshll.u32 %s1113_s24, 2 }
  0x36   : > { %v397_v4 = vmax.f32 %v395_v2, %v396_v3  ;;  %v403_v6 = vrot.slane %v402_v5, 4  ;;  %s329_s18 = scalar_lea.vmem %s1094_s1, %s709_s8  ;;  %v366_v38 = vsub.s32 0, %v363_v34  ;;  %v370_v40 = vsub.s32 1, %v363_v34  ;;  %s344_s30 = scalar_lea.vmem %s1099_s6, %s710_s19 }
  0x37   : > { %v356_v31 = vld [vmem:[%s329_s18] sm:$0x3]  ;;  %354 = vst.msk [vmem:[%s344_s30] sm:$0xf] %vm352_vm4, %v872_v43  ;;  %s1049_s13 = scalar_lea.vmem %s1096_s3, %s1113_s24  ;;  %s1058_s20 = scalar_lea.vmem %s1097_s4, %s1113_s24 }
  0x38   : > { %v398_v7 = vrot.slane %v397_v4, 2  ;;  %v404_v8 = vmax.f32 %v402_v5, %v403_v6  ;;  %vm358_vm1 = vcmp.ne.s32.totalorder %v356_v31, 4294967196  ;;  %350 = vst.msk [vmem:[%s1049_s13] sm:$0x1] %vm349_vm5, %v872_v43  ;;  %s340_s15 = scalar_lea.vmem %s1098_s5, %s710_s19  ;;  %351 = vst.msk [vmem:[%s1058_s20] sm:$0x1] %vm349_vm5, %v872_v43 }
  0x39   : > { %v361_v39 = vsel %vm358_vm1, %v356_v31, 0  ;;  %v712_v44 = vsel %vm358_vm1, 1.0, %v872_v43  ;;  %353 = vst.msk [vmem:[%s340_s15] sm:$0xf] %vm352_vm4, %v872_v43 }
  0x3a   : > { %v399_v9 = vmax.f32 %v397_v4, %v398_v7  ;;  %v405_v10 = vrot.slane %v404_v8, 2  ;;  %v367_v41 = vrot.slane %v361_v39, %v366_v38  ;;  %v371_v42 = vrot.slane %v361_v39, %v370_v40 }
  0x3b   : > { %v382_v47 = vrot.slane %v712_v44, %v366_v38  ;;  %v386_v52 = vrot.slane %v712_v44, %v370_v40 }
  0x3c   : > { %v400_v11 = vrot.slane %v399_v9, 1  ;;  %v406_v12 = vmax.f32 %v404_v8, %v405_v10  ;;  %vm372_vm2 = vcmp.eq.s32.totalorder %v363_v34, %v367_v41  ;;  %vm373_vm3 = vcmp.eq.s32.totalorder %v363_v34, %v371_v42 }
  0x3d   : > { %v713_v50 = vsel %vm372_vm2, 1.0, %v872_v43  ;;  %v714_v54 = vsel %vm373_vm3, 1.0, %v872_v43  ;;  %v497_v58 = vcombine.low %v382_v47, %v386_v52 }
  0x3e   : > { %v401_v13 = vmax.f32 %v399_v9, %v400_v11  ;;  %v407_v14 = vrot.slane %v406_v12, 1  ;;  %v389_v56 = vmul.f32 %v713_v50, %v382_v47  ;;  %v390_v60 = vmul.f32 %v714_v54, %v386_v52 }
  0x40   : > { %v408_v15 = vmax.f32 %v406_v12, %v407_v14  ;;  %v459_v4 = vsel %vm394_vm0, %v389_v56, 0.0  ;;  %v460_v5 = vsel %vm394_vm0, %v390_v60, 0.0  ;;  %v503_v12 = vcombine.low %v389_v56, %v390_v60  ;;  %v357_v14 = vld [vmem:[%s1095_s2] sm:$0xf] }
  0x41   : > { %v461_v8 = vadd.f32 %v460_v5, %v459_v4 }
  0x42   : > { %v411_v16 = vcombine.low %v401_v13, %v408_v15 }
  0x44   : > { %v413_v17 = vsub.f32 %v355_v0, %v411_v16 }
  0x46   : > { %v414_v18 = vmul.f32 1.442695, %v413_v17 }
  0x48   : > { %779 = vpow2.f32 %v414_v18 }
  0x52   : > { %v780_v19 = vpop.eup %779 }
  0x53   : > { %v417_v20 = vcombine.high %v780_v19, %v780_v19  ;;  %v419_v21 = vsel %vm394_vm0, %v780_v19, 0.0 }
  0x54   : > { %v420_v22 = vrot.slane %v419_v21, 4 }
  0x55   : > { %v426_v23 = vsel %vm394_vm0, %v417_v20, 0.0 }
  0x56   : > { %v421_v24 = vadd.f32 %v420_v22, %v419_v21  ;;  %v427_v25 = vrot.slane %v426_v23, 4 }
  0x58   : > { %v422_v26 = vrot.slane %v421_v24, 2  ;;  %v428_v27 = vadd.f32 %v427_v25, %v426_v23  ;;  %v516_v25 = vld [vmem:[%s344_s30] sm:$0xf] }
  0x5a   : > { %v423_v29 = vadd.f32 %v422_v26, %v421_v24  ;;  %v429_v30 = vrot.slane %v428_v27, 2 }
  0x5c   : > { %v424_v32 = vrot.slane %v423_v29, 1  ;;  %v430_v33 = vadd.f32 %v429_v30, %v428_v27 }
  0x5e   : > { %v425_v35 = vadd.f32 %v424_v32, %v423_v29  ;;  %v431_v36 = vrot.slane %v430_v33, 1 }
  0x60   : > { %v432_v37 = vadd.f32 %v431_v36, %v430_v33  ;;  %781 = vlog2.f32 %v425_v35 }
  0x61   : > { %783 = vrcp.f32 %v425_v35  ;;  %v500_v35 = vld [vmem:[%s340_s15] sm:$0xf] }
  0x62   : > { %785 = vlog2.f32 %v432_v37 }
  0x63   : > { %787 = vrcp.f32 %v432_v37 }
  0x6a   : > { %v782_v45 = vpop.eup %781 }
  0x6b   : > { %v784_v46 = vpop.eup %783  ;;  %v434_v48 = vmul.f32 0.6931472, %v782_v45 }
  0x6c   : > { %v786_v49 = vpop.eup %785 }
  0x6d   : > { %v788_v51 = vpop.eup %787  ;;  %v436_v53 = vmul.f32 0.6931472, %v786_v49  ;;  %v482_v49 = vld [vmem:[%s1058_s20] sm:$0x1] }
  0x6e   : > { %v446_v55 = vcombine.low %v784_v46, %v788_v51  ;;  %v464_v46 = vld [vmem:[%s1049_s13] sm:$0x1] }
  0x6f   : > { %v439_v57 = vcombine.low %v434_v48, %v436_v53 }
  0x70   : > { %v448_v59 = vmul.f32 %v780_v19, %v446_v55 }
  0x71   : > { %v441_v61 = vsub.f32 %v413_v17, %v439_v57 }
  0x72   : > { %v499_v0 = vmul.f32 %v497_v58, %v448_v59 }
  0x73   : > { %v450_v62 = vcombine.high %v441_v61, %v441_v61  ;;  %v452_v63 = vmul.f32 %v441_v61, %v389_v56 }
  0x74   : > { %v518_v6 = vcombine.high %v499_v0, %v499_v0  ;;  %v520_v9 = vsel %vm394_vm0, %v499_v0, 0.0  ;;  %v505_v13 = vmul.f32 %v503_v12, %v499_v0 }
  0x75   : > { %v453_v1 = vmul.f32 %v450_v62, %v390_v60  ;;  %v454_v2 = vsel %vm394_vm0, %v452_v63, 0.0 }
  0x76   : > { %v521_v10 = vsel %vm394_vm0, %v518_v6, 0.0  ;;  %v507_v17 = vcombine.high %v505_v13, %v505_v13  ;;  %v509_v21 = vsel %vm394_vm0, %v505_v13, 0.0 }
  0x77   : > { %v455_v3 = vsel %vm394_vm0, %v453_v1, 0.0  ;;  %v522_v11 = vadd.f32 %v521_v10, %v520_v9 }
  0x78   : > { %v456_v7 = vadd.f32 %v455_v3, %v454_v2  ;;  %v510_v22 = vsel %vm394_vm0, %v507_v17, 0.0 }
  0x79   : > { %v511_v26 = vadd.f32 %v510_v22, %v509_v21 }
  0x7a   : > { %457 = vadd.xlane.f32.xlu0 %v456_v7 }
  0x7e   : > { %462 = vadd.xlane.f32.xlu0 %v461_v8 }
  0x82   : > { %523 = vadd.xlane.f32.xlu0 %v522_v11 }
 0x107   : > { %v458_v15 = vpop.xlane.xlu0 %457 }
 0x108   : > { %v465_v16 = vmul.f32 %v458_v15, %v357_v14 }
 0x10a   : > { %v467_v18 = vsel %vm352_vm4, %v465_v16, 0.0 }
 0x10b   : > { %468 = vadd.xlane.f32.xlu1 %v467_v18  ;;  %v463_v19 = vpop.xlane.xlu0 %462 }
 0x10c   : > { %v483_v20 = vmul.f32 %v463_v19, %v357_v14 }
 0x10e   : > { %v484_v23 = vsel %vm352_vm4, %v483_v20, 0.0 }
 0x10f   : > { %485 = vadd.xlane.f32.xlu1 %v484_v23  ;;  %v524_v24 = vpop.xlane.xlu0 %523 }
 0x110   : > { %v525_v27 = vadd.f32 %v524_v24, %v463_v19 }
 0x112   : > { %v526_v28 = vadd.f32 %v525_v27, %v516_v25 }
 0x113   : > { %512 = vadd.xlane.f32.xlu1 %v511_v26 }
 0x114   : > { %527 = vst.msk [vmem:[%s344_s30] sm:$0xf] %vm352_vm4, %v526_v28 }
 0x198   : > { %v469_v29 = vpop.xlane.xlu1 %468 }
 0x199   : > { %v470_v30 = vrot.slane %v469_v29, 4 }
 0x19b   : > { %v471_v31 = vadd.f32 %v470_v30, %v469_v29 }
 0x19c   : > { %v486_v32 = vpop.xlane.xlu1 %485 }
 0x19d   : > { %v472_v33 = vrot.slane %v471_v31, 2  ;;  %v487_v34 = vrot.slane %v486_v32, 4 }
 0x19f   : > { %v488_v36 = vadd.f32 %v487_v34, %v486_v32  ;;  %v473_v37 = vadd.f32 %v472_v33, %v471_v31 }
 0x1a0   : > { %v513_v38 = vpop.xlane.xlu1 %512 }
 0x1a1   : > { %v489_v39 = vrot.slane %v488_v36, 2  ;;  %v474_v40 = vrot.slane %v473_v37, 1  ;;  %v514_v41 = vadd.f32 %v513_v38, %v500_v35 }
 0x1a3   : > { %v475_v42 = vadd.f32 %v474_v40, %v473_v37  ;;  %v490_v44 = vadd.f32 %v489_v39, %v488_v36  ;;  %515 = vst.msk [vmem:[%s340_s15] sm:$0xf] %vm352_vm4, %v514_v41 }
 0x1a5   : > { %718 = vpush %v475_v42  ;;  %v491_v43 = vrot.slane %v490_v44, 1 }
 0x1a7   : > { %v492_v45 = vadd.f32 %v491_v43, %v490_v44 }
 0x1a9   : > { %720 = vpush %v492_v45 }
 0x1d6   : > { %s719_s24 = spop %718 }
 0x1d7   : > { %v477_v47 = vstv %s719_s24 }
 0x1d8   : > { %v478_v48 = vsub.f32 0.0, %v477_v47 }
 0x1da   : > { %v479_v50 = vadd.f32 %v478_v48, %v464_v46  ;;  %s721_s17 = spop %720 }
 0x1db   : > { %v494_v51 = vstv %s721_s17 }
 0x1dc   : > { %481 = vst.msk [vmem:[%s1049_s13] sm:$0x1] %vm349_vm5, %v479_v50  ;;  %v495_v52 = vadd.f32 %v494_v51, %v482_v49 }
 0x1de   : > { %496 = vst.msk [vmem:[%s1058_s20] sm:$0x1] %vm349_vm5, %v495_v52 }
 0x1df PF: > { %s20_s26 = sadd.s32 1, %s869_s26   ;;  %s1105_s21 = smov %s853_s22 }
 0x1e0   : > { %p17_p9 = scmp.ge.s32.totalorder %s20_s26, 4   ;;  %s1106_s22 = smov %s857_s23 }
 0x1e1   : > { %s1107_s23 = smov %s957_s9  ;;  %s1108_s24 = smov %s865_s25 }
 0x1e2   : > { %s1109_s25 = smov %s1111_s28  ;;  %19 = sbr.rel (!%p17_p9) target bundleno = 4 (0x4), region = 115 }
 0x1e9   :  { %585 = vsyncpa [#allocation3], 1 }
 0x1ea   :  { %587 = vsyncpa [#allocation3 + $0x1], 1 }

</bundles_post_ra>
